<compile_context>
chip_gen: v6e
topology: v6e:2x2x1
jax: 0.10.0
libtpu: 0.0.40
codegen_flags: <defaults>
</compile_context>

<pallas_src>
import jax
import jax.numpy as jnp
from jax import lax
from jax.experimental import pallas as pl
from jax.experimental.pallas import tpu as pltpu


def simple_nn_kernel(x_ref, w1_ref, b1_ref, w2_ref, b2_ref, o_ref):
    # x_ref: (4, ROWS, 128) VMEM, o_ref: (3, ROWS, 128) VMEM.
    # w1_ref: (40,), b1_ref: (10,), w2_ref: (30,), b2_ref: (3,)  -- all SMEM.
    rows = x_ref.shape[1]                       # static (block shape)
    chunk = 16 if rows % 16 == 0 else 8         # sublane rows per inner step
    n_chunks = rows // chunk                    # rows is always a multiple of 8

    # Hoist all 83 parameter scalars out of the loop (SMEM sld -> sreg splat).
    w1 = [[w1_ref[4 * j + k] for k in range(4)] for j in range(10)]
    b1 = [b1_ref[j] for j in range(10)]
    w2 = [[w2_ref[10 * j + k] for k in range(10)] for j in range(3)]
    b2 = [b2_ref[j] for j in range(3)]

    def body(c, carry):
        r0 = pl.multiple_of(c * chunk, chunk)
        # Four dense input planes of shape (chunk, 128).
        xs = [x_ref[k, pl.ds(r0, chunk), :] for k in range(4)]

        # Layer 1: h_j = relu(sum_k w1[j,k] * x_k + b1[j])   (scalar x plane FMA)
        hs = []
        for j in range(10):
            h = xs[0] * w1[j][0]
            for k in range(1, 4):
                h = h + xs[k] * w1[j][k]
            hs.append(jnp.maximum(h + b1[j], 0.0))

        # Layer 2: y_j = sum_k w2[j,k] * h_k + b2[j], stored straight to output.
        for j in range(3):
            y = hs[0] * w2[j][0]
            for k in range(1, 10):
                y = y + hs[k] * w2[j][k]
            o_ref[j, pl.ds(r0, chunk), :] = (y + b2[j]).astype(o_ref.dtype)
        return carry

    lax.fori_loop(0, n_chunks, body, 0, unroll=True)


def simple_nn_forward(x, w1, b1, w2, b2, *, tb=32768):
    """Forward pass of SimpleNN.

    x  : (B, 4) float32 (PyTorch-style row-major batch)
    w1 : (10, 4), b1: (10,), w2: (3, 10), b2: (3,)   (PyTorch (out, in) layout)
    Returns (B, 3) float32.
    """
    B = x.shape[0]
    ALIGN = 1024  # plane layout: blocks are (feat, rows, 128) with rows % 8 == 0

    # Clamp the tile size: multiple of 1024, and small enough that the
    # double-buffered in+out tiles (~56 bytes / element) stay well under the
    # v5e 16 MiB scoped-VMEM default (and v7x's 64 MiB physical VMEM).
    tb = int(tb)
    tb = max(ALIGN, min((tb // ALIGN) * ALIGN, 131072))

    b_aligned = pl.cdiv(B, ALIGN) * ALIGN
    # At least 2 grid steps when there is enough work, so the "parallel"
    # batch axis can be split across v7x's two TensorCores.
    n_steps = max(pl.cdiv(b_aligned, tb), 2 if b_aligned >= 2 * ALIGN else 1)
    TB = pl.cdiv(pl.cdiv(b_aligned, n_steps), ALIGN) * ALIGN
    Bp = n_steps * TB
    rows_blk = TB // 128
    rows_tot = Bp // 128

    # Single fused copy: transpose to feature-major and pad the batch tail;
    # the reshape to (4, Bp/128, 128) planes is free (contiguous).
    # TODO(synk): a production caller should keep activations feature-major
    # end-to-end and skip this transpose and the one on the output.
    xT = jnp.pad(jnp.transpose(x), ((0, 0), (0, Bp - B)))      # (4, Bp)
    x_planes = xT.reshape(4, rows_tot, 128)

    # Flatten weights for compact SMEM residency (1-D SMEM avoids 2-D padding).
    w1_flat = w1.reshape(-1)        # (40,)
    w2_flat = w2.reshape(-1)        # (30,)

    # Memory-bound custom call: advise XLA's scheduler.
    flops = 2 * Bp * (4 * 10 + 10 * 3) + 10 * Bp
    bytes_accessed = 4 * (4 * Bp + 3 * Bp) + 4 * (40 + 10 + 30 + 3)

    y_planes = pl.pallas_call(
        simple_nn_kernel,
        out_shape=jax.ShapeDtypeStruct((3, rows_tot, 128), jnp.float32),
        grid_spec=pltpu.PrefetchScalarGridSpec(
            num_scalar_prefetch=0,
            grid=(n_steps,),
            in_specs=[
                pl.BlockSpec((4, rows_blk, 128), lambda i: (0, i, 0)),
                pl.BlockSpec(memory_space=pltpu.MemorySpace.SMEM),   # w1 (40,)
                pl.BlockSpec(memory_space=pltpu.MemorySpace.SMEM),   # b1 (10,)
                pl.BlockSpec(memory_space=pltpu.MemorySpace.SMEM),   # w2 (30,)
                pl.BlockSpec(memory_space=pltpu.MemorySpace.SMEM),   # b2 (3,)
            ],
            out_specs=pl.BlockSpec((3, rows_blk, 128), lambda i: (0, i, 0)),
        ),
        compiler_params=pltpu.CompilerParams(
            dimension_semantics=("parallel",),                       # megacore split
        ),
        cost_estimate=pl.CostEstimate(
            flops=flops, transcendentals=0, bytes_accessed=bytes_accessed),
    )(x_planes, w1_flat, b1, w2_flat, b2)

    # Drop batch padding and return PyTorch-style (B, 3).
    yT = y_planes.reshape(3, Bp)[:, :B]
    return jnp.transpose(yT)


def init_params(key):
    # Deterministic synthetic parameters matching nn.Linear init
    # (uniform(-1/sqrt(fan_in), 1/sqrt(fan_in))), in PyTorch (out, in) layout.
    k1, k2, k3, k4 = jax.random.split(key, 4)
    bound1 = 1.0 / jnp.sqrt(4.0)
    bound2 = 1.0 / jnp.sqrt(10.0)
    w1 = jax.random.uniform(k1, (10, 4), jnp.float32, -bound1, bound1)
    b1 = jax.random.uniform(k2, (10,), jnp.float32, -bound1, bound1)
    w2 = jax.random.uniform(k3, (3, 10), jnp.float32, -bound2, bound2)
    b2 = jax.random.uniform(k4, (3,), jnp.float32, -bound2, bound2)
    return w1, b1, w2, b2


if __name__ == "__main__":
    key = jax.random.PRNGKey(0)
    k_x, k_x2, k_p = jax.random.split(key, 3)

    w1, b1, w2, b2 = init_params(k_p)

    def torch_ref(x):
        # Pure-JAX reference of the PyTorch forward pass.
        return jnp.maximum(x @ w1.T + b1, 0.0) @ w2.T + b2

    # Small single-tile case (grid = 1).
    B = 8
    x = jax.random.normal(k_x, (B, 4), jnp.float32)
    out = jax.block_until_ready(simple_nn_forward(x, w1, b1, w2, b2))
    assert out.shape == (B, 3)
    assert jnp.allclose(out, torch_ref(x), atol=1e-5, rtol=1e-5)

    # Multi-tile case: grid > 1, SMEM params resident across steps, padded tail.
    B2 = 3000
    x2 = jax.random.normal(k_x2, (B2, 4), jnp.float32)
    out2 = jax.block_until_ready(simple_nn_forward(x2, w1, b1, w2, b2, tb=2048))
    assert out2.shape == (B2, 3)
    assert jnp.allclose(out2, torch_ref(x2), atol=1e-5, rtol=1e-5)

    print("KERNEL_OK")
</pallas_src>

<mosaic_0001>
module attributes {stable_mosaic.version = 11 : i64} {
  func.func @simple_nn_kernel(%arg0: i32, %arg1: memref<4x8x128xf32, #tpu.memory_space<vmem>>, %arg2: memref<40xf32, #tpu.memory_space<smem>>, %arg3: memref<10xf32, #tpu.memory_space<smem>>, %arg4: memref<30xf32, #tpu.memory_space<smem>>, %arg5: memref<3xf32, #tpu.memory_space<smem>>, %arg6: memref<3x8x128xf32, #tpu.memory_space<vmem>>) attributes {dimension_semantics = [#tpu.dimension_semantics<parallel>], iteration_bounds = array<i64: 1>, scalar_prefetch = 0 : i64, scratch_operands = 0 : i64, tpu.core_type = #tpu.core_type<tc>, window_params = [{transform_indices = @transform_0, window_bounds = array<i64: 4, 8, 128>}, {transform_indices = @transform_1, window_bounds = array<i64: 40>}, {transform_indices = @transform_2, window_bounds = array<i64: 10>}, {transform_indices = @transform_3, window_bounds = array<i64: 30>}, {transform_indices = @transform_4, window_bounds = array<i64: 3>}, {transform_indices = @transform_5, window_bounds = array<i64: 3, 8, 128>}]} {
    %c0 = arith.constant 0 : index
    %0 = memref.load %arg2[%c0] : memref<40xf32, #tpu.memory_space<smem>>
    %c1 = arith.constant 1 : index
    %1 = memref.load %arg2[%c1] : memref<40xf32, #tpu.memory_space<smem>>
    %c2 = arith.constant 2 : index
    %2 = memref.load %arg2[%c2] : memref<40xf32, #tpu.memory_space<smem>>
    %c3 = arith.constant 3 : index
    %3 = memref.load %arg2[%c3] : memref<40xf32, #tpu.memory_space<smem>>
    %c4 = arith.constant 4 : index
    %4 = memref.load %arg2[%c4] : memref<40xf32, #tpu.memory_space<smem>>
    %c5 = arith.constant 5 : index
    %5 = memref.load %arg2[%c5] : memref<40xf32, #tpu.memory_space<smem>>
    %c6 = arith.constant 6 : index
    %6 = memref.load %arg2[%c6] : memref<40xf32, #tpu.memory_space<smem>>
    %c7 = arith.constant 7 : index
    %7 = memref.load %arg2[%c7] : memref<40xf32, #tpu.memory_space<smem>>
    %c8 = arith.constant 8 : index
    %8 = memref.load %arg2[%c8] : memref<40xf32, #tpu.memory_space<smem>>
    %c9 = arith.constant 9 : index
    %9 = memref.load %arg2[%c9] : memref<40xf32, #tpu.memory_space<smem>>
    %c10 = arith.constant 10 : index
    %10 = memref.load %arg2[%c10] : memref<40xf32, #tpu.memory_space<smem>>
    %c11 = arith.constant 11 : index
    %11 = memref.load %arg2[%c11] : memref<40xf32, #tpu.memory_space<smem>>
    %c12 = arith.constant 12 : index
    %12 = memref.load %arg2[%c12] : memref<40xf32, #tpu.memory_space<smem>>
    %c13 = arith.constant 13 : index
    %13 = memref.load %arg2[%c13] : memref<40xf32, #tpu.memory_space<smem>>
    %c14 = arith.constant 14 : index
    %14 = memref.load %arg2[%c14] : memref<40xf32, #tpu.memory_space<smem>>
    %c15 = arith.constant 15 : index
    %15 = memref.load %arg2[%c15] : memref<40xf32, #tpu.memory_space<smem>>
    %c16 = arith.constant 16 : index
    %16 = memref.load %arg2[%c16] : memref<40xf32, #tpu.memory_space<smem>>
    %c17 = arith.constant 17 : index
    %17 = memref.load %arg2[%c17] : memref<40xf32, #tpu.memory_space<smem>>
    %c18 = arith.constant 18 : index
    %18 = memref.load %arg2[%c18] : memref<40xf32, #tpu.memory_space<smem>>
    %c19 = arith.constant 19 : index
    %19 = memref.load %arg2[%c19] : memref<40xf32, #tpu.memory_space<smem>>
    %c20 = arith.constant 20 : index
    %20 = memref.load %arg2[%c20] : memref<40xf32, #tpu.memory_space<smem>>
    %c21 = arith.constant 21 : index
    %21 = memref.load %arg2[%c21] : memref<40xf32, #tpu.memory_space<smem>>
    %c22 = arith.constant 22 : index
    %22 = memref.load %arg2[%c22] : memref<40xf32, #tpu.memory_space<smem>>
    %c23 = arith.constant 23 : index
    %23 = memref.load %arg2[%c23] : memref<40xf32, #tpu.memory_space<smem>>
    %c24 = arith.constant 24 : index
    %24 = memref.load %arg2[%c24] : memref<40xf32, #tpu.memory_space<smem>>
    %c25 = arith.constant 25 : index
    %25 = memref.load %arg2[%c25] : memref<40xf32, #tpu.memory_space<smem>>
    %c26 = arith.constant 26 : index
    %26 = memref.load %arg2[%c26] : memref<40xf32, #tpu.memory_space<smem>>
    %c27 = arith.constant 27 : index
    %27 = memref.load %arg2[%c27] : memref<40xf32, #tpu.memory_space<smem>>
    %c28 = arith.constant 28 : index
    %28 = memref.load %arg2[%c28] : memref<40xf32, #tpu.memory_space<smem>>
    %c29 = arith.constant 29 : index
    %29 = memref.load %arg2[%c29] : memref<40xf32, #tpu.memory_space<smem>>
    %c30 = arith.constant 30 : index
    %30 = memref.load %arg2[%c30] : memref<40xf32, #tpu.memory_space<smem>>
    %c31 = arith.constant 31 : index
    %31 = memref.load %arg2[%c31] : memref<40xf32, #tpu.memory_space<smem>>
    %c32 = arith.constant 32 : index
    %32 = memref.load %arg2[%c32] : memref<40xf32, #tpu.memory_space<smem>>
    %c33 = arith.constant 33 : index
    %33 = memref.load %arg2[%c33] : memref<40xf32, #tpu.memory_space<smem>>
    %c34 = arith.constant 34 : index
    %34 = memref.load %arg2[%c34] : memref<40xf32, #tpu.memory_space<smem>>
    %c35 = arith.constant 35 : index
    %35 = memref.load %arg2[%c35] : memref<40xf32, #tpu.memory_space<smem>>
    %c36 = arith.constant 36 : index
    %36 = memref.load %arg2[%c36] : memref<40xf32, #tpu.memory_space<smem>>
    %c37 = arith.constant 37 : index
    %37 = memref.load %arg2[%c37] : memref<40xf32, #tpu.memory_space<smem>>
    %c38 = arith.constant 38 : index
    %38 = memref.load %arg2[%c38] : memref<40xf32, #tpu.memory_space<smem>>
    %c39 = arith.constant 39 : index
    %39 = memref.load %arg2[%c39] : memref<40xf32, #tpu.memory_space<smem>>
    %c0_0 = arith.constant 0 : index
    %40 = memref.load %arg3[%c0_0] : memref<10xf32, #tpu.memory_space<smem>>
    %c1_1 = arith.constant 1 : index
    %41 = memref.load %arg3[%c1_1] : memref<10xf32, #tpu.memory_space<smem>>
    %c2_2 = arith.constant 2 : index
    %42 = memref.load %arg3[%c2_2] : memref<10xf32, #tpu.memory_space<smem>>
    %c3_3 = arith.constant 3 : index
    %43 = memref.load %arg3[%c3_3] : memref<10xf32, #tpu.memory_space<smem>>
    %c4_4 = arith.constant 4 : index
    %44 = memref.load %arg3[%c4_4] : memref<10xf32, #tpu.memory_space<smem>>
    %c5_5 = arith.constant 5 : index
    %45 = memref.load %arg3[%c5_5] : memref<10xf32, #tpu.memory_space<smem>>
    %c6_6 = arith.constant 6 : index
    %46 = memref.load %arg3[%c6_6] : memref<10xf32, #tpu.memory_space<smem>>
    %c7_7 = arith.constant 7 : index
    %47 = memref.load %arg3[%c7_7] : memref<10xf32, #tpu.memory_space<smem>>
    %c8_8 = arith.constant 8 : index
    %48 = memref.load %arg3[%c8_8] : memref<10xf32, #tpu.memory_space<smem>>
    %c9_9 = arith.constant 9 : index
    %49 = memref.load %arg3[%c9_9] : memref<10xf32, #tpu.memory_space<smem>>
    %c0_10 = arith.constant 0 : index
    %50 = memref.load %arg4[%c0_10] : memref<30xf32, #tpu.memory_space<smem>>
    %c1_11 = arith.constant 1 : index
    %51 = memref.load %arg4[%c1_11] : memref<30xf32, #tpu.memory_space<smem>>
    %c2_12 = arith.constant 2 : index
    %52 = memref.load %arg4[%c2_12] : memref<30xf32, #tpu.memory_space<smem>>
    %c3_13 = arith.constant 3 : index
    %53 = memref.load %arg4[%c3_13] : memref<30xf32, #tpu.memory_space<smem>>
    %c4_14 = arith.constant 4 : index
    %54 = memref.load %arg4[%c4_14] : memref<30xf32, #tpu.memory_space<smem>>
    %c5_15 = arith.constant 5 : index
    %55 = memref.load %arg4[%c5_15] : memref<30xf32, #tpu.memory_space<smem>>
    %c6_16 = arith.constant 6 : index
    %56 = memref.load %arg4[%c6_16] : memref<30xf32, #tpu.memory_space<smem>>
    %c7_17 = arith.constant 7 : index
    %57 = memref.load %arg4[%c7_17] : memref<30xf32, #tpu.memory_space<smem>>
    %c8_18 = arith.constant 8 : index
    %58 = memref.load %arg4[%c8_18] : memref<30xf32, #tpu.memory_space<smem>>
    %c9_19 = arith.constant 9 : index
    %59 = memref.load %arg4[%c9_19] : memref<30xf32, #tpu.memory_space<smem>>
    %c10_20 = arith.constant 10 : index
    %60 = memref.load %arg4[%c10_20] : memref<30xf32, #tpu.memory_space<smem>>
    %c11_21 = arith.constant 11 : index
    %61 = memref.load %arg4[%c11_21] : memref<30xf32, #tpu.memory_space<smem>>
    %c12_22 = arith.constant 12 : index
    %62 = memref.load %arg4[%c12_22] : memref<30xf32, #tpu.memory_space<smem>>
    %c13_23 = arith.constant 13 : index
    %63 = memref.load %arg4[%c13_23] : memref<30xf32, #tpu.memory_space<smem>>
    %c14_24 = arith.constant 14 : index
    %64 = memref.load %arg4[%c14_24] : memref<30xf32, #tpu.memory_space<smem>>
    %c15_25 = arith.constant 15 : index
    %65 = memref.load %arg4[%c15_25] : memref<30xf32, #tpu.memory_space<smem>>
    %c16_26 = arith.constant 16 : index
    %66 = memref.load %arg4[%c16_26] : memref<30xf32, #tpu.memory_space<smem>>
    %c17_27 = arith.constant 17 : index
    %67 = memref.load %arg4[%c17_27] : memref<30xf32, #tpu.memory_space<smem>>
    %c18_28 = arith.constant 18 : index
    %68 = memref.load %arg4[%c18_28] : memref<30xf32, #tpu.memory_space<smem>>
    %c19_29 = arith.constant 19 : index
    %69 = memref.load %arg4[%c19_29] : memref<30xf32, #tpu.memory_space<smem>>
    %c20_30 = arith.constant 20 : index
    %70 = memref.load %arg4[%c20_30] : memref<30xf32, #tpu.memory_space<smem>>
    %c21_31 = arith.constant 21 : index
    %71 = memref.load %arg4[%c21_31] : memref<30xf32, #tpu.memory_space<smem>>
    %c22_32 = arith.constant 22 : index
    %72 = memref.load %arg4[%c22_32] : memref<30xf32, #tpu.memory_space<smem>>
    %c23_33 = arith.constant 23 : index
    %73 = memref.load %arg4[%c23_33] : memref<30xf32, #tpu.memory_space<smem>>
    %c24_34 = arith.constant 24 : index
    %74 = memref.load %arg4[%c24_34] : memref<30xf32, #tpu.memory_space<smem>>
    %c25_35 = arith.constant 25 : index
    %75 = memref.load %arg4[%c25_35] : memref<30xf32, #tpu.memory_space<smem>>
    %c26_36 = arith.constant 26 : index
    %76 = memref.load %arg4[%c26_36] : memref<30xf32, #tpu.memory_space<smem>>
    %c27_37 = arith.constant 27 : index
    %77 = memref.load %arg4[%c27_37] : memref<30xf32, #tpu.memory_space<smem>>
    %c28_38 = arith.constant 28 : index
    %78 = memref.load %arg4[%c28_38] : memref<30xf32, #tpu.memory_space<smem>>
    %c29_39 = arith.constant 29 : index
    %79 = memref.load %arg4[%c29_39] : memref<30xf32, #tpu.memory_space<smem>>
    %c0_40 = arith.constant 0 : index
    %80 = memref.load %arg5[%c0_40] : memref<3xf32, #tpu.memory_space<smem>>
    %c1_41 = arith.constant 1 : index
    %81 = memref.load %arg5[%c1_41] : memref<3xf32, #tpu.memory_space<smem>>
    %c2_42 = arith.constant 2 : index
    %82 = memref.load %arg5[%c2_42] : memref<3xf32, #tpu.memory_space<smem>>
    %c0_i32 = arith.constant 0 : i32
    %c8_i32 = arith.constant 8 : i32
    %83 = arith.muli %c0_i32, %c8_i32 : i32
    %84 = tpu.assume_multiple %83, 8 : i32
    %c0_43 = arith.constant 0 : index
    %85 = arith.index_cast %84 : i32 to index
    %c0_44 = arith.constant 0 : index
    %86 = vector.load %arg1[%c0_43, %85, %c0_44] : memref<4x8x128xf32, #tpu.memory_space<vmem>>, vector<1x8x128xf32>
    %87 = vector.shape_cast %86 : vector<1x8x128xf32> to vector<8x128xf32>
    %c1_45 = arith.constant 1 : index
    %88 = arith.index_cast %84 : i32 to index
    %c0_46 = arith.constant 0 : index
    %89 = vector.load %arg1[%c1_45, %88, %c0_46] : memref<4x8x128xf32, #tpu.memory_space<vmem>>, vector<1x8x128xf32>
    %90 = vector.shape_cast %89 : vector<1x8x128xf32> to vector<8x128xf32>
    %c2_47 = arith.constant 2 : index
    %91 = arith.index_cast %84 : i32 to index
    %c0_48 = arith.constant 0 : index
    %92 = vector.load %arg1[%c2_47, %91, %c0_48] : memref<4x8x128xf32, #tpu.memory_space<vmem>>, vector<1x8x128xf32>
    %93 = vector.shape_cast %92 : vector<1x8x128xf32> to vector<8x128xf32>
    %c3_49 = arith.constant 3 : index
    %94 = arith.index_cast %84 : i32 to index
    %c0_50 = arith.constant 0 : index
    %95 = vector.load %arg1[%c3_49, %94, %c0_50] : memref<4x8x128xf32, #tpu.memory_space<vmem>>, vector<1x8x128xf32>
    %96 = vector.shape_cast %95 : vector<1x8x128xf32> to vector<8x128xf32>
    %97 = vector.broadcast %0 : f32 to vector<8x128xf32>
    %98 = arith.mulf %87, %97 : vector<8x128xf32>
    %99 = vector.broadcast %1 : f32 to vector<8x128xf32>
    %100 = arith.mulf %90, %99 : vector<8x128xf32>
    %101 = arith.addf %98, %100 : vector<8x128xf32>
    %102 = vector.broadcast %2 : f32 to vector<8x128xf32>
    %103 = arith.mulf %93, %102 : vector<8x128xf32>
    %104 = arith.addf %101, %103 : vector<8x128xf32>
    %105 = vector.broadcast %3 : f32 to vector<8x128xf32>
    %106 = arith.mulf %96, %105 : vector<8x128xf32>
    %107 = arith.addf %104, %106 : vector<8x128xf32>
    %108 = vector.broadcast %40 : f32 to vector<8x128xf32>
    %109 = arith.addf %107, %108 : vector<8x128xf32>
    %cst = arith.constant 0.000000e+00 : f32
    %110 = vector.broadcast %cst : f32 to vector<8x128xf32>
    %111 = arith.maximumf %109, %110 : vector<8x128xf32>
    %112 = vector.broadcast %4 : f32 to vector<8x128xf32>
    %113 = arith.mulf %87, %112 : vector<8x128xf32>
    %114 = vector.broadcast %5 : f32 to vector<8x128xf32>
    %115 = arith.mulf %90, %114 : vector<8x128xf32>
    %116 = arith.addf %113, %115 : vector<8x128xf32>
    %117 = vector.broadcast %6 : f32 to vector<8x128xf32>
    %118 = arith.mulf %93, %117 : vector<8x128xf32>
    %119 = arith.addf %116, %118 : vector<8x128xf32>
    %120 = vector.broadcast %7 : f32 to vector<8x128xf32>
    %121 = arith.mulf %96, %120 : vector<8x128xf32>
    %122 = arith.addf %119, %121 : vector<8x128xf32>
    %123 = vector.broadcast %41 : f32 to vector<8x128xf32>
    %124 = arith.addf %122, %123 : vector<8x128xf32>
    %cst_51 = arith.constant 0.000000e+00 : f32
    %125 = vector.broadcast %cst_51 : f32 to vector<8x128xf32>
    %126 = arith.maximumf %124, %125 : vector<8x128xf32>
    %127 = vector.broadcast %8 : f32 to vector<8x128xf32>
    %128 = arith.mulf %87, %127 : vector<8x128xf32>
    %129 = vector.broadcast %9 : f32 to vector<8x128xf32>
    %130 = arith.mulf %90, %129 : vector<8x128xf32>
    %131 = arith.addf %128, %130 : vector<8x128xf32>
    %132 = vector.broadcast %10 : f32 to vector<8x128xf32>
    %133 = arith.mulf %93, %132 : vector<8x128xf32>
    %134 = arith.addf %131, %133 : vector<8x128xf32>
    %135 = vector.broadcast %11 : f32 to vector<8x128xf32>
    %136 = arith.mulf %96, %135 : vector<8x128xf32>
    %137 = arith.addf %134, %136 : vector<8x128xf32>
    %138 = vector.broadcast %42 : f32 to vector<8x128xf32>
    %139 = arith.addf %137, %138 : vector<8x128xf32>
    %cst_52 = arith.constant 0.000000e+00 : f32
    %140 = vector.broadcast %cst_52 : f32 to vector<8x128xf32>
    %141 = arith.maximumf %139, %140 : vector<8x128xf32>
    %142 = vector.broadcast %12 : f32 to vector<8x128xf32>
    %143 = arith.mulf %87, %142 : vector<8x128xf32>
    %144 = vector.broadcast %13 : f32 to vector<8x128xf32>
    %145 = arith.mulf %90, %144 : vector<8x128xf32>
    %146 = arith.addf %143, %145 : vector<8x128xf32>
    %147 = vector.broadcast %14 : f32 to vector<8x128xf32>
    %148 = arith.mulf %93, %147 : vector<8x128xf32>
    %149 = arith.addf %146, %148 : vector<8x128xf32>
    %150 = vector.broadcast %15 : f32 to vector<8x128xf32>
    %151 = arith.mulf %96, %150 : vector<8x128xf32>
    %152 = arith.addf %149, %151 : vector<8x128xf32>
    %153 = vector.broadcast %43 : f32 to vector<8x128xf32>
    %154 = arith.addf %152, %153 : vector<8x128xf32>
    %cst_53 = arith.constant 0.000000e+00 : f32
    %155 = vector.broadcast %cst_53 : f32 to vector<8x128xf32>
    %156 = arith.maximumf %154, %155 : vector<8x128xf32>
    %157 = vector.broadcast %16 : f32 to vector<8x128xf32>
    %158 = arith.mulf %87, %157 : vector<8x128xf32>
    %159 = vector.broadcast %17 : f32 to vector<8x128xf32>
    %160 = arith.mulf %90, %159 : vector<8x128xf32>
    %161 = arith.addf %158, %160 : vector<8x128xf32>
    %162 = vector.broadcast %18 : f32 to vector<8x128xf32>
    %163 = arith.mulf %93, %162 : vector<8x128xf32>
    %164 = arith.addf %161, %163 : vector<8x128xf32>
    %165 = vector.broadcast %19 : f32 to vector<8x128xf32>
    %166 = arith.mulf %96, %165 : vector<8x128xf32>
    %167 = arith.addf %164, %166 : vector<8x128xf32>
    %168 = vector.broadcast %44 : f32 to vector<8x128xf32>
    %169 = arith.addf %167, %168 : vector<8x128xf32>
    %cst_54 = arith.constant 0.000000e+00 : f32
    %170 = vector.broadcast %cst_54 : f32 to vector<8x128xf32>
    %171 = arith.maximumf %169, %170 : vector<8x128xf32>
    %172 = vector.broadcast %20 : f32 to vector<8x128xf32>
    %173 = arith.mulf %87, %172 : vector<8x128xf32>
    %174 = vector.broadcast %21 : f32 to vector<8x128xf32>
    %175 = arith.mulf %90, %174 : vector<8x128xf32>
    %176 = arith.addf %173, %175 : vector<8x128xf32>
    %177 = vector.broadcast %22 : f32 to vector<8x128xf32>
    %178 = arith.mulf %93, %177 : vector<8x128xf32>
    %179 = arith.addf %176, %178 : vector<8x128xf32>
    %180 = vector.broadcast %23 : f32 to vector<8x128xf32>
    %181 = arith.mulf %96, %180 : vector<8x128xf32>
    %182 = arith.addf %179, %181 : vector<8x128xf32>
    %183 = vector.broadcast %45 : f32 to vector<8x128xf32>
    %184 = arith.addf %182, %183 : vector<8x128xf32>
    %cst_55 = arith.constant 0.000000e+00 : f32
    %185 = vector.broadcast %cst_55 : f32 to vector<8x128xf32>
    %186 = arith.maximumf %184, %185 : vector<8x128xf32>
    %187 = vector.broadcast %24 : f32 to vector<8x128xf32>
    %188 = arith.mulf %87, %187 : vector<8x128xf32>
    %189 = vector.broadcast %25 : f32 to vector<8x128xf32>
    %190 = arith.mulf %90, %189 : vector<8x128xf32>
    %191 = arith.addf %188, %190 : vector<8x128xf32>
    %192 = vector.broadcast %26 : f32 to vector<8x128xf32>
    %193 = arith.mulf %93, %192 : vector<8x128xf32>
    %194 = arith.addf %191, %193 : vector<8x128xf32>
    %195 = vector.broadcast %27 : f32 to vector<8x128xf32>
    %196 = arith.mulf %96, %195 : vector<8x128xf32>
    %197 = arith.addf %194, %196 : vector<8x128xf32>
    %198 = vector.broadcast %46 : f32 to vector<8x128xf32>
    %199 = arith.addf %197, %198 : vector<8x128xf32>
    %cst_56 = arith.constant 0.000000e+00 : f32
    %200 = vector.broadcast %cst_56 : f32 to vector<8x128xf32>
    %201 = arith.maximumf %199, %200 : vector<8x128xf32>
    %202 = vector.broadcast %28 : f32 to vector<8x128xf32>
    %203 = arith.mulf %87, %202 : vector<8x128xf32>
    %204 = vector.broadcast %29 : f32 to vector<8x128xf32>
    %205 = arith.mulf %90, %204 : vector<8x128xf32>
    %206 = arith.addf %203, %205 : vector<8x128xf32>
    %207 = vector.broadcast %30 : f32 to vector<8x128xf32>
    %208 = arith.mulf %93, %207 : vector<8x128xf32>
    %209 = arith.addf %206, %208 : vector<8x128xf32>
    %210 = vector.broadcast %31 : f32 to vector<8x128xf32>
    %211 = arith.mulf %96, %210 : vector<8x128xf32>
    %212 = arith.addf %209, %211 : vector<8x128xf32>
    %213 = vector.broadcast %47 : f32 to vector<8x128xf32>
    %214 = arith.addf %212, %213 : vector<8x128xf32>
    %cst_57 = arith.constant 0.000000e+00 : f32
    %215 = vector.broadcast %cst_57 : f32 to vector<8x128xf32>
    %216 = arith.maximumf %214, %215 : vector<8x128xf32>
    %217 = vector.broadcast %32 : f32 to vector<8x128xf32>
    %218 = arith.mulf %87, %217 : vector<8x128xf32>
    %219 = vector.broadcast %33 : f32 to vector<8x128xf32>
    %220 = arith.mulf %90, %219 : vector<8x128xf32>
    %221 = arith.addf %218, %220 : vector<8x128xf32>
    %222 = vector.broadcast %34 : f32 to vector<8x128xf32>
    %223 = arith.mulf %93, %222 : vector<8x128xf32>
    %224 = arith.addf %221, %223 : vector<8x128xf32>
    %225 = vector.broadcast %35 : f32 to vector<8x128xf32>
    %226 = arith.mulf %96, %225 : vector<8x128xf32>
    %227 = arith.addf %224, %226 : vector<8x128xf32>
    %228 = vector.broadcast %48 : f32 to vector<8x128xf32>
    %229 = arith.addf %227, %228 : vector<8x128xf32>
    %cst_58 = arith.constant 0.000000e+00 : f32
    %230 = vector.broadcast %cst_58 : f32 to vector<8x128xf32>
    %231 = arith.maximumf %229, %230 : vector<8x128xf32>
    %232 = vector.broadcast %36 : f32 to vector<8x128xf32>
    %233 = arith.mulf %87, %232 : vector<8x128xf32>
    %234 = vector.broadcast %37 : f32 to vector<8x128xf32>
    %235 = arith.mulf %90, %234 : vector<8x128xf32>
    %236 = arith.addf %233, %235 : vector<8x128xf32>
    %237 = vector.broadcast %38 : f32 to vector<8x128xf32>
    %238 = arith.mulf %93, %237 : vector<8x128xf32>
    %239 = arith.addf %236, %238 : vector<8x128xf32>
    %240 = vector.broadcast %39 : f32 to vector<8x128xf32>
    %241 = arith.mulf %96, %240 : vector<8x128xf32>
    %242 = arith.addf %239, %241 : vector<8x128xf32>
    %243 = vector.broadcast %49 : f32 to vector<8x128xf32>
    %244 = arith.addf %242, %243 : vector<8x128xf32>
    %cst_59 = arith.constant 0.000000e+00 : f32
    %245 = vector.broadcast %cst_59 : f32 to vector<8x128xf32>
    %246 = arith.maximumf %244, %245 : vector<8x128xf32>
    %247 = vector.broadcast %50 : f32 to vector<8x128xf32>
    %248 = arith.mulf %111, %247 : vector<8x128xf32>
    %249 = vector.broadcast %51 : f32 to vector<8x128xf32>
    %250 = arith.mulf %126, %249 : vector<8x128xf32>
    %251 = arith.addf %248, %250 : vector<8x128xf32>
    %252 = vector.broadcast %52 : f32 to vector<8x128xf32>
    %253 = arith.mulf %141, %252 : vector<8x128xf32>
    %254 = arith.addf %251, %253 : vector<8x128xf32>
    %255 = vector.broadcast %53 : f32 to vector<8x128xf32>
    %256 = arith.mulf %156, %255 : vector<8x128xf32>
    %257 = arith.addf %254, %256 : vector<8x128xf32>
    %258 = vector.broadcast %54 : f32 to vector<8x128xf32>
    %259 = arith.mulf %171, %258 : vector<8x128xf32>
    %260 = arith.addf %257, %259 : vector<8x128xf32>
    %261 = vector.broadcast %55 : f32 to vector<8x128xf32>
    %262 = arith.mulf %186, %261 : vector<8x128xf32>
    %263 = arith.addf %260, %262 : vector<8x128xf32>
    %264 = vector.broadcast %56 : f32 to vector<8x128xf32>
    %265 = arith.mulf %201, %264 : vector<8x128xf32>
    %266 = arith.addf %263, %265 : vector<8x128xf32>
    %267 = vector.broadcast %57 : f32 to vector<8x128xf32>
    %268 = arith.mulf %216, %267 : vector<8x128xf32>
    %269 = arith.addf %266, %268 : vector<8x128xf32>
    %270 = vector.broadcast %58 : f32 to vector<8x128xf32>
    %271 = arith.mulf %231, %270 : vector<8x128xf32>
    %272 = arith.addf %269, %271 : vector<8x128xf32>
    %273 = vector.broadcast %59 : f32 to vector<8x128xf32>
    %274 = arith.mulf %246, %273 : vector<8x128xf32>
    %275 = arith.addf %272, %274 : vector<8x128xf32>
    %276 = vector.broadcast %80 : f32 to vector<8x128xf32>
    %277 = arith.addf %275, %276 : vector<8x128xf32>
    %c0_60 = arith.constant 0 : index
    %278 = arith.index_cast %84 : i32 to index
    %c0_61 = arith.constant 0 : index
    %279 = vector.load %arg6[%c0_60, %278, %c0_61] : memref<3x8x128xf32, #tpu.memory_space<vmem>>, vector<1x8x128xf32>
    %280 = vector.shape_cast %279 : vector<1x8x128xf32> to vector<8x128xf32>
    %281 = vector.shape_cast %277 : vector<8x128xf32> to vector<1x8x128xf32>
    tpu.vector_store %arg6[%c0_60, %278, %c0_61], %281 {strides = array<i32>} : memref<3x8x128xf32, #tpu.memory_space<vmem>>, vector<1x8x128xf32>,
    %282 = vector.broadcast %60 : f32 to vector<8x128xf32>
    %283 = arith.mulf %111, %282 : vector<8x128xf32>
    %284 = vector.broadcast %61 : f32 to vector<8x128xf32>
    %285 = arith.mulf %126, %284 : vector<8x128xf32>
    %286 = arith.addf %283, %285 : vector<8x128xf32>
    %287 = vector.broadcast %62 : f32 to vector<8x128xf32>
    %288 = arith.mulf %141, %287 : vector<8x128xf32>
    %289 = arith.addf %286, %288 : vector<8x128xf32>
    %290 = vector.broadcast %63 : f32 to vector<8x128xf32>
    %291 = arith.mulf %156, %290 : vector<8x128xf32>
    %292 = arith.addf %289, %291 : vector<8x128xf32>
    %293 = vector.broadcast %64 : f32 to vector<8x128xf32>
    %294 = arith.mulf %171, %293 : vector<8x128xf32>
    %295 = arith.addf %292, %294 : vector<8x128xf32>
    %296 = vector.broadcast %65 : f32 to vector<8x128xf32>
    %297 = arith.mulf %186, %296 : vector<8x128xf32>
    %298 = arith.addf %295, %297 : vector<8x128xf32>
    %299 = vector.broadcast %66 : f32 to vector<8x128xf32>
    %300 = arith.mulf %201, %299 : vector<8x128xf32>
    %301 = arith.addf %298, %300 : vector<8x128xf32>
    %302 = vector.broadcast %67 : f32 to vector<8x128xf32>
    %303 = arith.mulf %216, %302 : vector<8x128xf32>
    %304 = arith.addf %301, %303 : vector<8x128xf32>
    %305 = vector.broadcast %68 : f32 to vector<8x128xf32>
    %306 = arith.mulf %231, %305 : vector<8x128xf32>
    %307 = arith.addf %304, %306 : vector<8x128xf32>
    %308 = vector.broadcast %69 : f32 to vector<8x128xf32>
    %309 = arith.mulf %246, %308 : vector<8x128xf32>
    %310 = arith.addf %307, %309 : vector<8x128xf32>
    %311 = vector.broadcast %81 : f32 to vector<8x128xf32>
    %312 = arith.addf %310, %311 : vector<8x128xf32>
    %c1_62 = arith.constant 1 : index
    %313 = arith.index_cast %84 : i32 to index
    %c0_63 = arith.constant 0 : index
    %314 = vector.load %arg6[%c1_62, %313, %c0_63] : memref<3x8x128xf32, #tpu.memory_space<vmem>>, vector<1x8x128xf32>
    %315 = vector.shape_cast %314 : vector<1x8x128xf32> to vector<8x128xf32>
    %316 = vector.shape_cast %312 : vector<8x128xf32> to vector<1x8x128xf32>
    tpu.vector_store %arg6[%c1_62, %313, %c0_63], %316 {strides = array<i32>} : memref<3x8x128xf32, #tpu.memory_space<vmem>>, vector<1x8x128xf32>,
    %317 = vector.broadcast %70 : f32 to vector<8x128xf32>
    %318 = arith.mulf %111, %317 : vector<8x128xf32>
    %319 = vector.broadcast %71 : f32 to vector<8x128xf32>
    %320 = arith.mulf %126, %319 : vector<8x128xf32>
    %321 = arith.addf %318, %320 : vector<8x128xf32>
    %322 = vector.broadcast %72 : f32 to vector<8x128xf32>
    %323 = arith.mulf %141, %322 : vector<8x128xf32>
    %324 = arith.addf %321, %323 : vector<8x128xf32>
    %325 = vector.broadcast %73 : f32 to vector<8x128xf32>
    %326 = arith.mulf %156, %325 : vector<8x128xf32>
    %327 = arith.addf %324, %326 : vector<8x128xf32>
    %328 = vector.broadcast %74 : f32 to vector<8x128xf32>
    %329 = arith.mulf %171, %328 : vector<8x128xf32>
    %330 = arith.addf %327, %329 : vector<8x128xf32>
    %331 = vector.broadcast %75 : f32 to vector<8x128xf32>
    %332 = arith.mulf %186, %331 : vector<8x128xf32>
    %333 = arith.addf %330, %332 : vector<8x128xf32>
    %334 = vector.broadcast %76 : f32 to vector<8x128xf32>
    %335 = arith.mulf %201, %334 : vector<8x128xf32>
    %336 = arith.addf %333, %335 : vector<8x128xf32>
    %337 = vector.broadcast %77 : f32 to vector<8x128xf32>
    %338 = arith.mulf %216, %337 : vector<8x128xf32>
    %339 = arith.addf %336, %338 : vector<8x128xf32>
    %340 = vector.broadcast %78 : f32 to vector<8x128xf32>
    %341 = arith.mulf %231, %340 : vector<8x128xf32>
    %342 = arith.addf %339, %341 : vector<8x128xf32>
    %343 = vector.broadcast %79 : f32 to vector<8x128xf32>
    %344 = arith.mulf %246, %343 : vector<8x128xf32>
    %345 = arith.addf %342, %344 : vector<8x128xf32>
    %346 = vector.broadcast %82 : f32 to vector<8x128xf32>
    %347 = arith.addf %345, %346 : vector<8x128xf32>
    %c2_64 = arith.constant 2 : index
    %348 = arith.index_cast %84 : i32 to index
    %c0_65 = arith.constant 0 : index
    %349 = vector.load %arg6[%c2_64, %348, %c0_65] : memref<3x8x128xf32, #tpu.memory_space<vmem>>, vector<1x8x128xf32>
    %350 = vector.shape_cast %349 : vector<1x8x128xf32> to vector<8x128xf32>
    %351 = vector.shape_cast %347 : vector<8x128xf32> to vector<1x8x128xf32>
    tpu.vector_store %arg6[%c2_64, %348, %c0_65], %351 {strides = array<i32>} : memref<3x8x128xf32, #tpu.memory_space<vmem>>, vector<1x8x128xf32>,
    %c1_i32 = arith.constant 1 : i32
    return
  }
  func.func @transform_0(%arg0: i32) -> (i32, i32, i32) {
    %c0_i32 = arith.constant 0 : i32
    %c0_i32_0 = arith.constant 0 : i32
    %c0_i32_1 = arith.constant 0 : i32
    return %c0_i32, %arg0, %c0_i32_0 : i32, i32, i32
  }
  func.func @transform_1(%arg0: i32) -> i32 {
    %c0_i32 = arith.constant 0 : i32
    %c0_i32_0 = arith.constant 0 : i32
    return %c0_i32 : i32
  }
  func.func @transform_2(%arg0: i32) -> i32 {
    %c0_i32 = arith.constant 0 : i32
    %c0_i32_0 = arith.constant 0 : i32
    return %c0_i32 : i32
  }
  func.func @transform_3(%arg0: i32) -> i32 {
    %c0_i32 = arith.constant 0 : i32
    %c0_i32_0 = arith.constant 0 : i32
    return %c0_i32 : i32
  }
  func.func @transform_4(%arg0: i32) -> i32 {
    %c0_i32 = arith.constant 0 : i32
    %c0_i32_0 = arith.constant 0 : i32
    return %c0_i32 : i32
  }
  func.func @transform_5(%arg0: i32) -> (i32, i32, i32) {
    %c0_i32 = arith.constant 0 : i32
    %c0_i32_0 = arith.constant 0 : i32
    %c0_i32_1 = arith.constant 0 : i32
    return %c0_i32, %arg0, %c0_i32_0 : i32, i32, i32
  }
}

</mosaic_0001>

<bundles_post_ra>
// kernel: tpu_custom_call.1
= control target key start
LH: loop header
LB: loop body
LE: loop exit
PB: predicated region body
PF: predicated region fallthrough
CT: control target
= control target key end

     0   :  { %10 = vsyncpa [#allocation3], 0  ;;  %s1006_s0 = inlined_call_operand.hbm [shape: f32[4,8,128], index: 0, kind: input, shape index: {}]   ;;  %s1007_s1 = inlined_call_operand.vmem [shape: f32[40], index: 1, kind: input, shape index: {}]   ;;  %s1008_s2 = inlined_call_operand.vmem [shape: f32[10], index: 2, kind: input, shape index: {}]   ;;  %s1009_s3 = inlined_call_operand.vmem [shape: f32[30], index: 3, kind: input, shape index: {}]   ;;  %s1010_s4 = inlined_call_operand.vmem [shape: f32[3], index: 4, kind: input, shape index: {}]   ;;  %s1011_s5 = inlined_call_operand.hbm [shape: f32[3,8,128], index: 5, kind: output, shape index: {}]  }
   0x1   :  { %11 = vsyncpa [#allocation5], 0 }
   0x2   :  { %12 = vsyncpa [#allocation8], 0 }
   0x3   :  { %13 = vsyncpa [#allocation11], 0  ;;  %s43_s20 = sshll.u32 %s1008_s2, 4  ;;  %s44_s20 = int_to_ptr.vmem [resolvable:$true] %s43_s20 }
   0x4   :  { %14 = vsyncpa [#allocation4], 0  ;;  %s526_s21 = scalar_lea.vmem %s44_s20, 16  ;;  %p531_p1 = scmp.lt.s32.totalorder %s44_s20, %s44_s20 }
   0x5   :  { %p527_p0 = scmp.ne.s32.totalorder %s44_s20, %s526_s21  ;;  %p532_p2 = scmp.lt.s32.totalorder %s526_s21, %s526_s21 }
   0x7   :  { %p533_p3 = por %p532_p2, %p531_p1 }
   0x9   :  { %p534_p4 = pnand %p533_p3, %p527_p0 }
   0xb   :  { %537 = shalt.err (!%p534_p4)
}
   0xc   :  { %s624_s22 = smov [#allocation7]   ;;  %s625_s23 = smov [#allocation2]  }
   0xd   :  { %46 = dma.vmem_to_smem %s44_s20, 16, %s624_s22, [#allocation8]  }
   0xe   :  { %s20_s24 = sshll.u32 %s625_s23, 4  ;;  %s21_s24 = int_to_ptr.vmem [resolvable:$true] %s20_s24 }
   0xf   :  { %s546_s25 = scalar_lea.vmem %s21_s24, 512  ;;  %p551_p6 = scmp.lt.s32.totalorder %s21_s24, %s21_s24 }
  0x10   :  { %p547_p5 = scmp.ne.s32.totalorder %s21_s24, %s546_s25  ;;  %p552_p7 = scmp.lt.s32.totalorder %s546_s25, %s546_s25 }
  0x12   :  { %p553_p8 = por %p552_p7, %p551_p6 }
  0x14   :  { %p554_p9 = pnand %p553_p8, %p547_p5 }
  0x16   :  { %557 = shalt.err (!%p554_p9)
}
  0x17   :  { %s626_s2 = smov 128   ;;  %s627_s26 = smov 8  }
  0x18   :  { %26 = dma.hbm_to_vmem [thread:$0]  %s1006_s0, 512, %s21_s24, [#allocation3], %s626_s2, %s626_s2, %s627_s26  }
  0x19   :  { %s33_s6 = sshll.u32 %s1007_s1, 4  ;;  %s53_s9 = sshll.u32 %s1009_s3, 4  ;;  %s34_s6 = int_to_ptr.vmem [resolvable:$true] %s33_s6  ;;  %s54_s9 = int_to_ptr.vmem [resolvable:$true] %s53_s9 }
  0x1a   :  { %s558_s10 = scalar_lea.vmem %s34_s6, 16  ;;  %p563_p11 = scmp.lt.s32.totalorder %s34_s6, %s34_s6 }
  0x1b   :  { %p559_p10 = scmp.ne.s32.totalorder %s34_s6, %s558_s10  ;;  %p564_p12 = scmp.lt.s32.totalorder %s558_s10, %s558_s10 }
  0x1d   :  { %p565_p13 = por %p564_p12, %p563_p11 }
  0x1f   :  { %p566_p0 = pnand %p565_p13, %p559_p10 }
  0x21   :  { %569 = shalt.err (!%p566_p0)
}
  0x22   :  { %s628_s11 = smov [#allocation6]   ;;  %s570_s0 = scalar_lea.vmem %s54_s9, 16 }
  0x23   :  { %36 = dma.vmem_to_smem %s34_s6, 16, %s628_s11, [#allocation5]  }
  0x24   :  { %p571_p1 = scmp.ne.s32.totalorder %s54_s9, %s570_s0  ;;  %p575_p2 = scmp.lt.s32.totalorder %s54_s9, %s54_s9 }
  0x25   :  { %p576_p3 = scmp.lt.s32.totalorder %s570_s0, %s570_s0 }
  0x27   :  { %p577_p4 = por %p576_p3, %p575_p2 }
  0x29   :  { %p578_p5 = pnand %p577_p4, %p571_p1 }
  0x2b   :  { %581 = shalt.err (!%p578_p5)
}
  0x2c   :  { %s629_s1 = smov [#allocation9]   ;;  %s63_s13 = sshll.u32 %s1010_s4, 4  ;;  %s64_s13 = int_to_ptr.vmem [resolvable:$true] %s63_s13 }
  0x2d   :  { %56 = dma.vmem_to_smem %s54_s9, 16, %s629_s1, [#allocation8]  }
  0x2e   :  { %s582_s14 = scalar_lea.vmem %s64_s13, 16  ;;  %p587_p7 = scmp.lt.s32.totalorder %s64_s13, %s64_s13 }
  0x2f   :  { %p583_p6 = scmp.ne.s32.totalorder %s64_s13, %s582_s14  ;;  %p588_p8 = scmp.lt.s32.totalorder %s582_s14, %s582_s14 }
  0x31   :  { %p589_p9 = por %p588_p8, %p587_p7 }
  0x33   :  { %p590_p10 = pnand %p589_p9, %p583_p6 }
  0x35   :  { %593 = shalt.err (!%p590_p10)
}
  0x36   :  { %s630_s15 = smov [#allocation10]  }
  0x37   :  { %66 = dma.vmem_to_smem %s64_s13, 16, %s630_s15, [#allocation11]  }
  0x38   :  { %614 = dma.done.wait [#allocation3], 512  }
  0x39   :  { %615 = vsyncadd [#allocation3], 4294966784 }
  0x3a   :  { %616 = dma.done.wait [#allocation5], 16  }
  0x3b   :  { %617 = vsyncadd [#allocation5], 4294967280 }
  0x3c   :  { %618 = dma.done.wait [#allocation8], 32  }
  0x3d   :  { %619 = vsyncadd [#allocation8], 4294967264 }
  0x3e   :  { %620 = dma.done.wait [#allocation11], 16  }
  0x3f   :  { %621 = vsyncadd [#allocation11], 4294967280 }
  0x40   :  { %82 = sfence }
  0x41   :  { %s83_s4 = sld [smem:[#allocation6]]  ;;  %v720_v0 = vld [vmem:[#allocation2] sm:$0xff]  ;;  %v722_v1 = vld [vmem:[#allocation2 + $0x8] sm:$0xff]  ;;  %v730_v4 = vld [vmem:[#allocation2 + $0x10] sm:$0xff] }
  0x42   :  { %s439_s16 = sld [smem:[#allocation6 + $0x1]]  ;;  %v748_v13 = vld [vmem:[#allocation2 + $0x18] sm:$0xff] }
  0x43   :  { %s680_s17 = sld [smem:[#allocation6 + $0x2]] }
  0x44   :  { %s682_s18 = sld [smem:[#allocation6 + $0x3]] }
  0x45   :  { %s684_s19 = sld [smem:[#allocation6 + $0x4]] }
  0x46   :  { %s686_s20 = sld [smem:[#allocation6 + $0x5]] }
  0x47   :  { %s688_s21 = sld [smem:[#allocation6 + $0x6]]  ;;  %v176_v2 = vstv %s83_s4 }
  0x48   :  { %s690_s22 = sld [smem:[#allocation6 + $0x7]]  ;;  %v178_v3 = vstv %s439_s16  ;;  %v177_v5 = vmul.f32 %v176_v2, %v720_v0 }
  0x49   :  { %s692_s23 = sld [smem:[#allocation6 + $0x8]]  ;;  %v179_v6 = vmul.f32 %v178_v3, %v722_v1  ;;  %v181_v7 = vstv %s680_s17 }
  0x4a   :  { %s694_s24 = sld [smem:[#allocation6 + $0x9]]  ;;  %v182_v10 = vmul.f32 %v181_v7, %v730_v4  ;;  %v184_v15 = vstv %s682_s18 }
  0x4b   :  { %s696_s25 = sld [smem:[#allocation6 + $0xa]]  ;;  %v190_v8 = vstv %s684_s19  ;;  %v180_v14 = vadd.f32 %v179_v6, %v177_v5  ;;  %v185_v26 = vmul.f32 %v184_v15, %v748_v13 }
  0x4c   :  { %s698_s27 = sld [smem:[#allocation6 + $0xb]]  ;;  %v192_v9 = vstv %s686_s20  ;;  %v191_v18 = vmul.f32 %v190_v8, %v720_v0 }
  0x4d   :  { %s700_s28 = sld [smem:[#allocation6 + $0xc]]  ;;  %v193_v19 = vmul.f32 %v192_v9, %v722_v1  ;;  %v195_v22 = vstv %s688_s21  ;;  %v183_v30 = vadd.f32 %v182_v10, %v180_v14 }
  0x4e   :  { %s702_s29 = sld [smem:[#allocation6 + $0xd]]  ;;  %v198_v23 = vstv %s690_s22  ;;  %v196_v35 = vmul.f32 %v195_v22, %v730_v4 }
  0x4f   :  { %s704_s30 = sld [smem:[#allocation6 + $0xe]]  ;;  %v204_v11 = vstv %s692_s23  ;;  %v194_v34 = vadd.f32 %v193_v19, %v191_v18  ;;  %v199_v36 = vmul.f32 %v198_v23, %v748_v13  ;;  %v186_v5 = vadd.f32 %v185_v26, %v183_v30 }
  0x50   :  { %s706_s6 = sld [smem:[#allocation6 + $0xf]]  ;;  %v206_v12 = vstv %s694_s24  ;;  %v205_v24 = vmul.f32 %v204_v11, %v720_v0 }
  0x51   :  { %s708_s7 = sld [smem:[#allocation6 + $0x10]]  ;;  %v207_v25 = vmul.f32 %v206_v12, %v722_v1  ;;  %v209_v27 = vstv %s696_s25  ;;  %v197_v50 = vadd.f32 %v196_v35, %v194_v34 }
  0x52   :  { %s710_s8 = sld [smem:[#allocation6 + $0x11]]  ;;  %v210_v39 = vmul.f32 %v209_v27, %v730_v4  ;;  %v212_v42 = vstv %s698_s27 }
  0x53   :  { %s712_s9 = sld [smem:[#allocation6 + $0x12]]  ;;  %v218_v16 = vstv %s700_s28  ;;  %v208_v38 = vadd.f32 %v207_v25, %v205_v24  ;;  %v213_v55 = vmul.f32 %v212_v42, %v748_v13  ;;  %v200_v14 = vadd.f32 %v199_v36, %v197_v50 }
  0x54   :  { %s714_s10 = sld [smem:[#allocation6 + $0x13]]  ;;  %v220_v17 = vstv %s702_s29  ;;  %v219_v28 = vmul.f32 %v218_v16, %v720_v0 }
  0x55   :  { %s716_s11 = sld [smem:[#allocation6 + $0x14]]  ;;  %v221_v29 = vmul.f32 %v220_v17, %v722_v1  ;;  %v223_v31 = vstv %s704_s30  ;;  %v211_v54 = vadd.f32 %v210_v39, %v208_v38 }
  0x56   :  { %s718_s0 = sld [smem:[#allocation6 + $0x15]]  ;;  %v224_v44 = vmul.f32 %v223_v31, %v730_v4  ;;  %v226_v45 = vstv %s706_s6 }
  0x57   :  { %s724_s1 = sld [smem:[#allocation6 + $0x16]]  ;;  %v232_v20 = vstv %s708_s7  ;;  %v222_v43 = vadd.f32 %v221_v29, %v219_v28  ;;  %v227_v56 = vmul.f32 %v226_v45, %v748_v13  ;;  %v214_v18 = vadd.f32 %v213_v55, %v211_v54 }
  0x58   :  { %s726_s3 = sld [smem:[#allocation6 + $0x17]]  ;;  %v234_v21 = vstv %s710_s8  ;;  %v233_v32 = vmul.f32 %v232_v20, %v720_v0 }
  0x59   :  { %s728_s12 = sld [smem:[#allocation6 + $0x18]]  ;;  %v235_v33 = vmul.f32 %v234_v21, %v722_v1  ;;  %v237_v37 = vstv %s712_s9  ;;  %v225_v62 = vadd.f32 %v224_v44, %v222_v43 }
  0x5a   :  { %s735_s13 = sld [smem:[#allocation6 + $0x19]]  ;;  %v238_v47 = vmul.f32 %v237_v37, %v730_v4  ;;  %v240_v51 = vstv %s714_s10 }
  0x5b   :  { %s737_s14 = sld [smem:[#allocation6 + $0x1a]]  ;;  %v246_v40 = vstv %s716_s11  ;;  %v236_v46 = vadd.f32 %v235_v33, %v233_v32  ;;  %v241_v2 = vmul.f32 %v240_v51, %v748_v13  ;;  %v228_v19 = vadd.f32 %v227_v56, %v225_v62 }
  0x5c   :  { %s741_s15 = sld [smem:[#allocation6 + $0x1b]]  ;;  %v248_v41 = vstv %s718_s0  ;;  %v247_v52 = vmul.f32 %v246_v40, %v720_v0 }
  0x5d   :  { %s746_s4 = sld [smem:[#allocation6 + $0x1c]]  ;;  %v249_v53 = vmul.f32 %v248_v41, %v722_v1  ;;  %v251_v57 = vstv %s724_s1  ;;  %v239_v63 = vadd.f32 %v238_v47, %v236_v46 }
  0x5e   :  { %s753_s16 = sld [smem:[#allocation6 + $0x1d]]  ;;  %v252_v7 = vmul.f32 %v251_v57, %v730_v4  ;;  %v254_v8 = vstv %s726_s3 }
  0x5f   :  { %s759_s17 = sld [smem:[#allocation6 + $0x1e]]  ;;  %v260_v48 = vstv %s728_s12  ;;  %v250_v6 = vadd.f32 %v249_v53, %v247_v52  ;;  %v242_v20 = vadd.f32 %v241_v2, %v239_v63  ;;  %v255_v22 = vmul.f32 %v254_v8, %v748_v13 }
  0x60   :  { %s765_s18 = sld [smem:[#allocation6 + $0x1f]]  ;;  %v262_v49 = vstv %s735_s13  ;;  %v261_v58 = vmul.f32 %v260_v48, %v720_v0 }
  0x61   :  { %s771_s19 = sld [smem:[#allocation6 + $0x20]]  ;;  %v263_v59 = vmul.f32 %v262_v49, %v722_v1  ;;  %v265_v3 = vstv %s737_s14  ;;  %v253_v27 = vadd.f32 %v252_v7, %v250_v6 }
  0x62   :  { %s776_s20 = sld [smem:[#allocation6 + $0x21]]  ;;  %v266_v16 = vmul.f32 %v265_v3, %v730_v4  ;;  %v268_v21 = vstv %s741_s15 }
  0x63   :  { %s781_s21 = sld [smem:[#allocation6 + $0x22]]  ;;  %v274_v60 = vstv %s746_s4  ;;  %v264_v15 = vadd.f32 %v263_v59, %v261_v58  ;;  %v269_v32 = vmul.f32 %v268_v21, %v748_v13  ;;  %v256_v50 = vadd.f32 %v255_v22, %v253_v27 }
  0x64   :  { %s786_s22 = sld [smem:[#allocation6 + $0x23]]  ;;  %v276_v61 = vstv %s753_s16  ;;  %v275_v9 = vmul.f32 %v274_v60, %v720_v0 }
  0x65   :  { %s791_s23 = sld [smem:[#allocation6 + $0x24]]  ;;  %v277_v10 = vmul.f32 %v276_v61, %v722_v1  ;;  %v279_v17 = vstv %s759_s17  ;;  %v267_v31 = vadd.f32 %v266_v16, %v264_v15 }
  0x66   :  { %s796_s24 = sld [smem:[#allocation6 + $0x25]]  ;;  %v280_v29 = vmul.f32 %v279_v17, %v730_v4  ;;  %v282_v33 = vstv %s765_s18 }
  0x67   :  { %s801_s25 = sld [smem:[#allocation6 + $0x26]]  ;;  %v288_v11 = vstv %s771_s19  ;;  %v278_v28 = vadd.f32 %v277_v10, %v275_v9  ;;  %v283_v45 = vmul.f32 %v282_v33, %v748_v13 }
  0x68   :  { %s806_s27 = sld [smem:[#allocation6 + $0x27]]  ;;  %v290_v12 = vstv %s776_s20  ;;  %v289_v23 = vmul.f32 %v288_v11, %v720_v0 }
  0x69   :  { %s812_s28 = sld [smem:[#allocation7]]  ;;  %v291_v24 = vmul.f32 %v290_v12, %v722_v1  ;;  %v293_v25 = vstv %s781_s21  ;;  %v281_v44 = vadd.f32 %v280_v29, %v278_v28 }
  0x6a   :  { %s816_s29 = sld [smem:[#allocation7 + $0x1]]  ;;  %v294_v35 = vmul.f32 %v293_v25, %v730_v4  ;;  %v296_v41 = vstv %s786_s22 }
  0x6b   :  { %s820_s30 = sld [smem:[#allocation7 + $0x2]]  ;;  %v302_v36 = vstv %s791_s23  ;;  %v292_v40 = vadd.f32 %v291_v24, %v289_v23  ;;  %v297_v51 = vmul.f32 %v296_v41, %v748_v13  ;;  %v284_v57 = vadd.f32 %v283_v45, %v281_v44 }
  0x6c   :  { %s826_s6 = sld [smem:[#allocation7 + $0x3]]  ;;  %v304_v37 = vstv %s796_s24  ;;  %v303_v47 = vmul.f32 %v302_v36, %v720_v0 }
  0x6d   :  { %s830_s7 = sld [smem:[#allocation7 + $0x4]]  ;;  %v305_v48 = vmul.f32 %v304_v37, %v722_v1  ;;  %v307_v52 = vstv %s801_s25  ;;  %v295_v56 = vadd.f32 %v294_v35, %v292_v40  ;;  %v270_v1 = vadd.f32 %v269_v32, %v267_v31 }
  0x6e   :  { %s833_s8 = sld [smem:[#allocation7 + $0x5]]  ;;  %v308_v61 = vmul.f32 %v307_v52, %v730_v4  ;;  %v310_v2 = vstv %s806_s27 }
  0x6f   :  { %s839_s9 = sld [smem:[#allocation7 + $0x6]]  ;;  %v187_v26 = vstv %s812_s28  ;;  %v306_v60 = vadd.f32 %v305_v48, %v303_v47  ;;  %v298_v6 = vadd.f32 %v297_v51, %v295_v56 }
  0x70   :  { %s843_s10 = sld [smem:[#allocation7 + $0x7]]  ;;  %v201_v30 = vstv %s816_s29  ;;  %v188_v38 = vadd.f32 %v187_v26, %v186_v5 }
  0x71   :  { %s848_s11 = sld [smem:[#allocation7 + $0x8]]  ;;  %v215_v34 = vstv %s820_s30  ;;  %v202_v42 = vadd.f32 %v201_v30, %v200_v14  ;;  %v309_v12 = vadd.f32 %v308_v61, %v306_v60  ;;  %v311_v14 = vmul.f32 %v310_v2, %v748_v13 }
  0x72   :  { %s854_s0 = sld [smem:[#allocation7 + $0x9]]  ;;  %v229_v39 = vstv %s826_s6  ;;  %v216_v46 = vadd.f32 %v215_v34, %v214_v18  ;;  %v872_v53 = vmax.f32 %v188_v38, 0.0 }
  0x73   :  { %s858_s1 = sld [smem:[#allocation9]]  ;;  %v243_v43 = vstv %s830_s7  ;;  %v230_v49 = vadd.f32 %v229_v39, %v228_v19  ;;  %v877_v0 = vmax.f32 %v202_v42, 0.0  ;;  %v312_v26 = vadd.f32 %v311_v14, %v309_v12 }
  0x74   :  { %s862_s3 = sld [smem:[#allocation9 + $0x1]]  ;;  %v244_v54 = vadd.f32 %v243_v43, %v242_v20  ;;  %v257_v55 = vstv %s833_s8  ;;  %v881_v58 = vmax.f32 %v216_v46, 0.0 }
  0x75   :  { %s866_s12 = sld [smem:[#allocation9 + $0x2]]  ;;  %v271_v59 = vstv %s839_s9  ;;  %v887_v62 = vmax.f32 %v230_v49, 0.0  ;;  %v258_v63 = vadd.f32 %v257_v55, %v256_v50 }
  0x76   :  { %s870_s13 = sld [smem:[#allocation9 + $0x3]]  ;;  %v893_v5 = vmax.f32 %v244_v54, 0.0  ;;  %v272_v4 = vadd.f32 %v271_v59, %v270_v1  ;;  %v285_v9 = vstv %s843_s10 }
  0x77   :  { %s875_s14 = sld [smem:[#allocation9 + $0x4]]  ;;  %v907_v17 = vmax.f32 %v258_v63, 0.0  ;;  %v286_v21 = vadd.f32 %v285_v9, %v284_v57  ;;  %v299_v22 = vstv %s848_s11 }
  0x78   :  { %s879_s15 = sld [smem:[#allocation9 + $0x5]]  ;;  %v915_v24 = vmax.f32 %v272_v4, 0.0  ;;  %v300_v28 = vadd.f32 %v299_v22, %v298_v6  ;;  %v313_v29 = vstv %s854_s0 }
  0x79   :  { %s885_s4 = sld [smem:[#allocation9 + $0x6]]  ;;  %v316_v3 = vstv %s858_s1  ;;  %v927_v32 = vmax.f32 %v286_v21, 0.0  ;;  %v314_v37 = vadd.f32 %v313_v29, %v312_v26 }
  0x7a   :  { %s891_s16 = sld [smem:[#allocation9 + $0x7]]  ;;  %v317_v7 = vmul.f32 %v316_v3, %v872_v53  ;;  %v318_v8 = vstv %s862_s3  ;;  %v938_v40 = vmax.f32 %v300_v28, 0.0 }
  0x7b   :  { %s897_s17 = sld [smem:[#allocation9 + $0x8]]  ;;  %v319_v10 = vmul.f32 %v318_v8, %v877_v0  ;;  %v321_v11 = vstv %s866_s12  ;;  %v956_v56 = vmax.f32 %v314_v37, 0.0 }
  0x7c   :  { %s902_s18 = sld [smem:[#allocation9 + $0x9]]  ;;  %v322_v15 = vmul.f32 %v321_v11, %v881_v58  ;;  %v324_v16 = vstv %s870_s13 }
  0x7d   :  { %s496_s19 = sld [smem:[#allocation9 + $0xa]]  ;;  %v320_v18 = vadd.f32 %v319_v10, %v317_v7  ;;  %v325_v19 = vmul.f32 %v324_v16, %v887_v62  ;;  %v327_v20 = vstv %s875_s14 }
  0x7e   :  { %s497_s20 = sld [smem:[#allocation9 + $0xb]]  ;;  %v330_v23 = vstv %s879_s15  ;;  %v328_v25 = vmul.f32 %v327_v20, %v893_v5  ;;  %s631_s15 = smov [#allocation12]  }
  0x7f   :  { %s913_s21 = sld [smem:[#allocation9 + $0xc]]  ;;  %v323_v13 = vadd.f32 %v322_v15, %v320_v18  ;;  %v333_v27 = vstv %s885_s4  ;;  %v331_v31 = vmul.f32 %v330_v23, %v907_v17  ;;  %s419_s4 = sshll.u32 %s631_s15, 4  ;;  %s420_s4 = int_to_ptr.vmem [resolvable:$true] %s419_s4 }
  0x80   :  { %s918_s22 = sld [smem:[#allocation9 + $0xd]]  ;;  %v334_v34 = vmul.f32 %v333_v27, %v915_v24  ;;  %v336_v35 = vstv %s891_s16  ;;  %s594_s16 = scalar_lea.vmem %s420_s4, 384 }
  0x81   :  { %s921_s23 = sld [smem:[#allocation9 + $0xe]]  ;;  %v326_v30 = vadd.f32 %v325_v19, %v323_v13  ;;  %v337_v44 = vmul.f32 %v336_v35, %v927_v32  ;;  %v339_v45 = vstv %s897_s17  ;;  %p595_p11 = scmp.ne.s32.totalorder %s420_s4, %s594_s16 }
  0x82   :  { %s925_s24 = sld [smem:[#allocation9 + $0xf]]  ;;  %v340_v57 = vmul.f32 %v339_v45, %v938_v40  ;;  %v342_v60 = vstv %s902_s18  ;;  %p599_p12 = scmp.lt.s32.totalorder %s420_s4, %s420_s4 }
  0x83   :  { %s929_s25 = sld [smem:[#allocation9 + $0x10]]  ;;  %v329_v33 = vadd.f32 %v328_v25, %v326_v30  ;;  %v348_v36 = vstv %s496_s19  ;;  %v343_v9 = vmul.f32 %v342_v60, %v956_v56  ;;  %p600_p13 = scmp.lt.s32.totalorder %s594_s16, %s594_s16 }
  0x84   :  { %s933_s27 = sld [smem:[#allocation9 + $0x11]]  ;;  %v349_v38 = vmul.f32 %v348_v36, %v872_v53  ;;  %v350_v39 = vstv %s497_s20 }
  0x85   :  { %s936_s28 = sld [smem:[#allocation9 + $0x12]]  ;;  %v332_v41 = vadd.f32 %v331_v31, %v329_v33  ;;  %v351_v42 = vmul.f32 %v350_v39, %v877_v0  ;;  %v353_v43 = vstv %s913_s21  ;;  %p601_p0 = por %p600_p13, %p599_p12 }
  0x86   :  { %s942_s29 = sld [smem:[#allocation9 + $0x13]]  ;;  %v354_v46 = vmul.f32 %v353_v43, %v881_v58  ;;  %v356_v47 = vstv %s918_s22 }
  0x87   :  { %s506_s30 = sld [smem:[#allocation9 + $0x14]]  ;;  %v335_v48 = vadd.f32 %v334_v34, %v332_v41  ;;  %v352_v49 = vadd.f32 %v351_v42, %v349_v38  ;;  %v357_v50 = vmul.f32 %v356_v47, %v887_v62  ;;  %v359_v51 = vstv %s921_s23  ;;  %p602_p1 = pnand %p601_p0, %p595_p11 }
  0x88   :  { %s507_s6 = sld [smem:[#allocation9 + $0x15]]  ;;  %v362_v52 = vstv %s925_s24  ;;  %v360_v55 = vmul.f32 %v359_v51, %v893_v5 }
  0x89   :  { %s951_s7 = sld [smem:[#allocation9 + $0x16]]  ;;  %v355_v54 = vadd.f32 %v354_v46, %v352_v49  ;;  %v338_v1 = vadd.f32 %v337_v44, %v335_v48  ;;  %v365_v59 = vstv %s929_s25  ;;  %v363_v63 = vmul.f32 %v362_v52, %v907_v17 }
  0x8a   :  { %s954_s8 = sld [smem:[#allocation9 + $0x17]]  ;;  %v368_v2 = vstv %s933_s27  ;;  %v366_v6 = vmul.f32 %v365_v59, %v915_v24 }
  0x8b   :  { %s960_s9 = sld [smem:[#allocation9 + $0x18]]  ;;  %v358_v61 = vadd.f32 %v357_v50, %v355_v54  ;;  %v371_v7 = vstv %s936_s28  ;;  %v341_v4 = vadd.f32 %v340_v57, %v338_v1  ;;  %v369_v14 = vmul.f32 %v368_v2, %v927_v32 }
  0x8c   :  { %s964_s10 = sld [smem:[#allocation9 + $0x19]]  ;;  %v372_v18 = vmul.f32 %v371_v7, %v938_v40  ;;  %v374_v19 = vstv %s942_s29 }
  0x8d   :  { %s967_s11 = sld [smem:[#allocation9 + $0x1a]]  ;;  %v361_v3 = vadd.f32 %v360_v55, %v358_v61  ;;  %v381_v8 = vstv %s506_s30  ;;  %v375_v26 = vmul.f32 %v374_v19, %v956_v56  ;;  %v344_v29 = vadd.f32 %v343_v9, %v341_v4 }
  0x8e   :  { %s971_s0 = sld [smem:[#allocation9 + $0x1b]]  ;;  %v382_v10 = vmul.f32 %v381_v8, %v872_v53  ;;  %v383_v11 = vstv %s507_s6 }
  0x8f   :  { %s975_s1 = sld [smem:[#allocation9 + $0x1c]]  ;;  %v364_v12 = vadd.f32 %v363_v63, %v361_v3  ;;  %v384_v15 = vmul.f32 %v383_v11, %v877_v0  ;;  %v386_v16 = vstv %s951_s7 }
  0x90   :  { %s980_s3 = sld [smem:[#allocation9 + $0x1d]]  ;;  %v387_v20 = vmul.f32 %v386_v16, %v881_v58  ;;  %v389_v53 = vstv %s954_s8 }
  0x91   :  { %s163_s12 = sld [smem:[#allocation10]]  ;;  %v367_v21 = vadd.f32 %v366_v6, %v364_v12  ;;  %v385_v22 = vadd.f32 %v384_v15, %v382_v10  ;;  %v390_v23 = vmul.f32 %v389_v53, %v887_v62  ;;  %v392_v13 = vstv %s960_s9 }
  0x92   :  { %s516_s13 = sld [smem:[#allocation10 + $0x1]]  ;;  %v395_v25 = vstv %s964_s10  ;;  %v393_v28 = vmul.f32 %v392_v13, %v893_v5 }
  0x93   :  { %v370_v0 = vadd.f32 %v369_v14, %v367_v21  ;;  %v388_v27 = vadd.f32 %v387_v20, %v385_v22  ;;  %v398_v30 = vstv %s967_s11  ;;  %v396_v33 = vmul.f32 %v395_v25, %v907_v17  ;;  %s517_s14 = sld [smem:[#allocation10 + $0x2]] }
  0x94   :  { %v401_v34 = vstv %s971_s0  ;;  %v399_v37 = vmul.f32 %v398_v30, %v915_v24 }
  0x95   :  { %v373_v58 = vadd.f32 %v372_v18, %v370_v0  ;;  %v391_v31 = vadd.f32 %v390_v23, %v388_v27  ;;  %v404_v41 = vstv %s975_s1  ;;  %v402_v5 = vmul.f32 %v401_v34, %v927_v32 }
  0x96   :  { %v407_v44 = vstv %s980_s3  ;;  %v405_v17 = vmul.f32 %v404_v41, %v938_v40 }
  0x97   :  { %v345_v35 = vstv %s163_s12  ;;  %v376_v62 = vadd.f32 %v375_v26, %v373_v58  ;;  %v394_v36 = vadd.f32 %v393_v28, %v391_v31  ;;  %v408_v47 = vmul.f32 %v407_v44, %v956_v56 }
  0x98   :  { %v346_v38 = vadd.f32 %v345_v35, %v344_v29  ;;  %v377_v39 = vstv %s516_s13 }
  0x99   :  { %v378_v42 = vadd.f32 %v377_v39, %v376_v62  ;;  %v397_v43 = vadd.f32 %v396_v33, %v394_v36  ;;  %v410_v49 = vstv %s517_s14 }
  0x9a   :  { %347 = vst [vmem:[#allocation12] sm:$0xff] %v346_v38 }
  0x9b   :  { %380 = vst [vmem:[#allocation12 + $0x8] sm:$0xff] %v378_v42  ;;  %v400_v45 = vadd.f32 %v399_v37, %v397_v43 }
  0x9d   :  { %v403_v46 = vadd.f32 %v402_v5, %v400_v45 }
  0x9f   :  { %v406_v48 = vadd.f32 %v405_v17, %v403_v46 }
  0xa1   :  { %v409_v24 = vadd.f32 %v408_v47, %v406_v48 }
  0xa3   :  { %v411_v50 = vadd.f32 %v410_v49, %v409_v24 }
  0xa5   :  { %413 = vst [vmem:[#allocation12 + $0x10] sm:$0xff] %v411_v50 }
  0xa6   :  { %605 = shalt.err (!%p602_p1)
}
  0xa7   :  { %425 = dma.vmem_to_hbm [thread:$0]  %s420_s4, 384, %s1011_s5, [#allocation4], %s626_s2, %s626_s2, %s627_s26  }
  0xa8   :  { %622 = dma.done.wait [#allocation4], 384  }
  0xa9   :  { %623 = vsyncadd [#allocation4], 4294966912 }
  0xaa   :  { %429 = vsyncpa [#allocation3], 1 }
  0xab   :  { %430 = vsyncpa [#allocation4], 1 }
  0xac   :  { %431 = vsyncpa [#allocation5], 1 }
  0xad   :  { %432 = vsyncpa [#allocation8], 1 }
  0xae   :  { %433 = vsyncpa [#allocation11], 1 }

</bundles_post_ra>
